<compile_context>
chip_gen: v7x
topology: tpu7x:2x2x1
jax: 0.10.0
libtpu: 0.0.40
codegen_flags: <defaults>
</compile_context>

<pallas_src>
import jax
import jax.numpy as jnp
from jax.experimental import pallas as pl
from jax.experimental.pallas import tpu as pltpu


def _add3_kernel(a_ref, b_ref, c_ref, o_ref):
    # x259 = x258 + x243 ; x275 = x274 + x259
    o_ref[...] = a_ref[...] + b_ref[...] + c_ref[...]


def add3(x258, x243, x274):
    assert x258.shape == x243.shape == x274.shape
    assert x258.dtype == x243.dtype == x274.dtype
    orig_shape = x258.shape
    n = x258.size
    lane = 128
    # 37632 = 294 * 128 → exact lane-dense factorization, no padding required.
    assert n % lane == 0, "flat size must be a multiple of 128 lanes"
    rows = n // lane  # 294; full-extent blocks are exempt from the (8,128) rule

    a2 = x258.reshape(rows, lane)
    b2 = x243.reshape(rows, lane)
    c2 = x274.reshape(rows, lane)  # aliased to the output (dead after the add)

    itemsize = jnp.dtype(x258.dtype).itemsize
    out2 = pl.pallas_call(
        _add3_kernel,
        out_shape=jax.ShapeDtypeStruct((rows, lane), x258.dtype),
        in_specs=[
            pl.BlockSpec(memory_space=pltpu.MemorySpace.VMEM),
            pl.BlockSpec(memory_space=pltpu.MemorySpace.VMEM),
            pl.BlockSpec(memory_space=pltpu.MemorySpace.VMEM),
        ],
        out_specs=pl.BlockSpec(memory_space=pltpu.MemorySpace.VMEM),
        # Write the result in place over x274's buffer (input index 2 → output 0).
        input_output_aliases={2: 0},
        # 2 adds per element; 3 reads + 1 write of `itemsize` bytes per element.
        cost_estimate=pl.CostEstimate(
            flops=2 * n,
            bytes_accessed=4 * n * itemsize,
            transcendentals=0,
        ),
    )(a2, b2, c2)

    return out2.reshape(orig_shape)


if __name__ == "__main__":
    key = jax.random.PRNGKey(0)
    k1, k2, k3 = jax.random.split(key, 3)
    shape = (1, 192, 14, 14)  # matches the PyTorch module's tensors
    x243 = jax.random.normal(k1, shape, dtype=jnp.float32)
    x258 = jax.random.normal(k2, shape, dtype=jnp.float32)
    x274 = jax.random.normal(k3, shape, dtype=jnp.float32)

    # Compute the reference BEFORE the kernel: x274's buffer is aliased to the
    # kernel output, so it must not be read afterwards.
    ref = x274 + (x258 + x243)
    jax.block_until_ready(ref)

    out = add3(x258, x243, x274)
    jax.block_until_ready(out)

    assert out.shape == shape
    assert jnp.allclose(out, ref, atol=1e-6), "mismatch vs reference"
    print("KERNEL_OK")
</pallas_src>

<mosaic_0001>
module attributes {stable_mosaic.version = 11 : i64} {
  func.func @_add3_kernel(%arg0: memref<294x128xf32, #tpu.memory_space<vmem>>, %arg1: memref<294x128xf32, #tpu.memory_space<vmem>>, %arg2: memref<294x128xf32, #tpu.memory_space<vmem>>, %arg3: memref<294x128xf32, #tpu.memory_space<vmem>>) attributes {dimension_semantics = [], scalar_prefetch = 0 : i64, scratch_operands = 0 : i64, tpu.core_type = #tpu.core_type<tc>} {
    %c0 = arith.constant 0 : index
    %c0_0 = arith.constant 0 : index
    %0 = vector.load %arg0[%c0, %c0_0] : memref<294x128xf32, #tpu.memory_space<vmem>>, vector<294x128xf32>
    %c0_1 = arith.constant 0 : index
    %c0_2 = arith.constant 0 : index
    %1 = vector.load %arg1[%c0_1, %c0_2] : memref<294x128xf32, #tpu.memory_space<vmem>>, vector<294x128xf32>
    %2 = arith.addf %0, %1 : vector<294x128xf32>
    %c0_3 = arith.constant 0 : index
    %c0_4 = arith.constant 0 : index
    %3 = vector.load %arg2[%c0_3, %c0_4] : memref<294x128xf32, #tpu.memory_space<vmem>>, vector<294x128xf32>
    %4 = arith.addf %2, %3 : vector<294x128xf32>
    %c0_5 = arith.constant 0 : index
    %c0_6 = arith.constant 0 : index
    %5 = vector.load %arg3[%c0_5, %c0_6] : memref<294x128xf32, #tpu.memory_space<vmem>>, vector<294x128xf32>
    tpu.vector_store %arg3[%c0_5, %c0_6], %4 {strides = array<i32>} : memref<294x128xf32, #tpu.memory_space<vmem>>, vector<294x128xf32>,
    return
  }
}

</mosaic_0001>

<bundles_post_ra>
// kernel: tpu_custom_call.1
= control target key start
LH: loop header
LB: loop body
LE: loop exit
PB: predicated region body
PF: predicated region fallthrough
CT: control target
= control target key end

     0   :  { %8 = vsyncpa [#allocation3], 0  ;;  %s596_s0 = inlined_call_operand.vmem [shape: f32[294,128], index: 0, kind: input, shape index: {}]   ;;  %s597_s1 = inlined_call_operand.vmem [shape: f32[294,128], index: 1, kind: input, shape index: {}]   ;;  %s598_s2 = inlined_call_operand.hbm [shape: f32[294,128], index: 2, kind: input, shape index: {}, may-alias: {2,3}]   ;;  %s599_s3 = inlined_call_operand.hbm [shape: f32[294,128], index: 3, kind: output, shape index: {}, may-alias: {2,3}]  }
   0x1   :  { %9 = vsyncpa [#allocation4], 0  ;;  %s320_s12 = smov [#allocation2]   ;;  %s272_s16 = scalar_lea.hbm %s598_s2, 4736 }
   0x2   :  { %s19_s13 = sshll.u32 %s320_s12, 4  ;;  %p273_p0 = scmp.ne.s32.totalorder %s598_s2, %s272_s16  ;;  %s20_s13 = int_to_ptr.vmem [resolvable:$true] %s19_s13 }
   0x3   :  { %p276_p1 = scmp.lt.u32.totalorder %s272_s16, %s598_s2 }
   0x5   :  { %p278_p2 = pnand %p276_p1, %p273_p0 }
   0x7   :  { %281 = shalt.err (!%p278_p2)
}
   0x8   :  { %s282_s21 = scalar_lea.vmem %s20_s13, 4736  ;;  %p287_p4 = scmp.lt.s32.totalorder %s20_s13, %s20_s13 }
   0x9   :  { %p283_p3 = scmp.ne.s32.totalorder %s20_s13, %s282_s21  ;;  %p288_p5 = scmp.lt.s32.totalorder %s282_s21, %s282_s21 }
   0xb   :  { %p289_p6 = por %p288_p5, %p287_p4 }
   0xd   :  { %p290_p7 = pnand %p289_p6, %p283_p3 }
   0xf   :  { %293 = shalt.err (!%p290_p7)
}
  0x10   :  { %s321_s22 = smov 128   ;;  %s322_s23 = smov 8  }
  0x11   :  { %25 = dma.hbm_to_vmem [thread:$0]  %s598_s2, 4736, %s20_s13, [#allocation3], %s321_s22, %s321_s22, %s322_s23  }
  0x12   :  { %316 = dma.done.wait [#allocation3], 4736  }
  0x13   :  { %317 = vsyncadd [#allocation3], 4294962560  ;;  %v29_v0 = vld [vmem:[%s596_s0] sm:$0xff]  ;;  %v30_v4 = vld [vmem:[%s596_s0 + $0x8] sm:$0xff]  ;;  %s323_s12 = smov [#allocation5]  }
  0x14   :  { %v66_v1 = vld [vmem:[%s597_s1] sm:$0xff]  ;;  %v67_v5 = vld [vmem:[%s597_s1 + $0x8] sm:$0xff]  ;;  %v31_v8 = vld [vmem:[%s596_s0 + $0x10] sm:$0xff]  ;;  %s256_s13 = sshll.u32 %s323_s12, 4  ;;  %s257_s13 = int_to_ptr.vmem [resolvable:$true] %s256_s13 }
  0x15   :  { %v140_v2 = vld [vmem:[#allocation2] sm:$0xff]  ;;  %v103_v3 = vadd.f32 %v66_v1, %v29_v0  ;;  %v141_v6 = vld [vmem:[#allocation2 + $0x8] sm:$0xff]  ;;  %v104_v7 = vadd.f32 %v67_v5, %v30_v4  ;;  %v68_v9 = vld [vmem:[%s597_s1 + $0x10] sm:$0xff]  ;;  %s294_s18 = scalar_lea.vmem %s257_s13, 4736  ;;  %p299_p9 = scmp.lt.s32.totalorder %s257_s13, %s257_s13 }
  0x16   :  { %v142_v10 = vld [vmem:[#allocation2 + $0x10] sm:$0xff]  ;;  %v105_v12 = vadd.f32 %v68_v9, %v31_v8  ;;  %v32_v13 = vld [vmem:[%s596_s0 + $0x18] sm:$0xff]  ;;  %v33_v18 = vld [vmem:[%s596_s0 + $0x20] sm:$0xff]  ;;  %p295_p8 = scmp.ne.s32.totalorder %s257_s13, %s294_s18  ;;  %p300_p10 = scmp.lt.s32.totalorder %s294_s18, %s294_s18 }
  0x17   :  { %v177_v11 = vadd.f32 %v140_v2, %v103_v3  ;;  %v69_v14 = vld [vmem:[%s597_s1 + $0x18] sm:$0xff]  ;;  %v178_v16 = vadd.f32 %v141_v6, %v104_v7  ;;  %v70_v19 = vld [vmem:[%s597_s1 + $0x20] sm:$0xff]  ;;  %v34_v23 = vld [vmem:[%s596_s0 + $0x28] sm:$0xff] }
  0x18   :  { %v143_v15 = vld [vmem:[#allocation2 + $0x18] sm:$0xff]  ;;  %v106_v17 = vadd.f32 %v69_v14, %v32_v13  ;;  %v144_v20 = vld [vmem:[#allocation2 + $0x20] sm:$0xff]  ;;  %v179_v21 = vadd.f32 %v142_v10, %v105_v12  ;;  %v107_v22 = vadd.f32 %v70_v19, %v33_v18  ;;  %v71_v24 = vld [vmem:[%s597_s1 + $0x28] sm:$0xff]  ;;  %p301_p11 = por %p300_p10, %p299_p9 }
  0x19   :  { %214 = vst [vmem:[#allocation5] sm:$0xff] %v177_v11  ;;  %v145_v25 = vld [vmem:[#allocation2 + $0x28] sm:$0xff]  ;;  %215 = vst [vmem:[#allocation5 + $0x8] sm:$0xff] %v178_v16  ;;  %v108_v27 = vadd.f32 %v71_v24, %v34_v23  ;;  %v35_v28 = vld [vmem:[%s596_s0 + $0x30] sm:$0xff] }
  0x1a   :  { %v180_v26 = vadd.f32 %v143_v15, %v106_v17  ;;  %v72_v29 = vld [vmem:[%s597_s1 + $0x30] sm:$0xff]  ;;  %216 = vst [vmem:[#allocation5 + $0x10] sm:$0xff] %v179_v21  ;;  %v181_v31 = vadd.f32 %v144_v20, %v107_v22  ;;  %v36_v33 = vld [vmem:[%s596_s0 + $0x38] sm:$0xff]  ;;  %v37_v38 = vld [vmem:[%s596_s0 + $0x40] sm:$0xff]  ;;  %p302_p12 = pnand %p301_p11, %p295_p8 }
  0x1b   :  { %v146_v30 = vld [vmem:[#allocation2 + $0x30] sm:$0xff]  ;;  %v109_v32 = vadd.f32 %v72_v29, %v35_v28  ;;  %v73_v34 = vld [vmem:[%s597_s1 + $0x38] sm:$0xff]  ;;  %v182_v36 = vadd.f32 %v145_v25, %v108_v27  ;;  %v74_v39 = vld [vmem:[%s597_s1 + $0x40] sm:$0xff] }
  0x1c   :  { %v147_v35 = vld [vmem:[#allocation2 + $0x38] sm:$0xff]  ;;  %217 = vst [vmem:[#allocation5 + $0x18] sm:$0xff] %v180_v26  ;;  %v110_v37 = vadd.f32 %v73_v34, %v36_v33  ;;  %v148_v40 = vld [vmem:[#allocation2 + $0x40] sm:$0xff]  ;;  %218 = vst [vmem:[#allocation5 + $0x20] sm:$0xff] %v181_v31  ;;  %v111_v42 = vadd.f32 %v74_v39, %v37_v38 }
  0x1d   :  { %v183_v41 = vadd.f32 %v146_v30, %v109_v32  ;;  %v38_v43 = vld [vmem:[%s596_s0 + $0x48] sm:$0xff]  ;;  %219 = vst [vmem:[#allocation5 + $0x28] sm:$0xff] %v182_v36  ;;  %v39_v48 = vld [vmem:[%s596_s0 + $0x50] sm:$0xff]  ;;  %v40_v53 = vld [vmem:[%s596_s0 + $0x58] sm:$0xff] }
  0x1e   :  { %v75_v44 = vld [vmem:[%s597_s1 + $0x48] sm:$0xff]  ;;  %v184_v46 = vadd.f32 %v147_v35, %v110_v37  ;;  %v76_v49 = vld [vmem:[%s597_s1 + $0x50] sm:$0xff]  ;;  %v185_v51 = vadd.f32 %v148_v40, %v111_v42  ;;  %v77_v54 = vld [vmem:[%s597_s1 + $0x58] sm:$0xff] }
  0x1f   :  { %v149_v45 = vld [vmem:[#allocation2 + $0x48] sm:$0xff]  ;;  %v112_v47 = vadd.f32 %v75_v44, %v38_v43  ;;  %v150_v50 = vld [vmem:[#allocation2 + $0x50] sm:$0xff]  ;;  %220 = vst [vmem:[#allocation5 + $0x30] sm:$0xff] %v183_v41  ;;  %v113_v52 = vadd.f32 %v76_v49, %v39_v48  ;;  %v151_v55 = vld [vmem:[#allocation2 + $0x58] sm:$0xff]  ;;  %v114_v57 = vadd.f32 %v77_v54, %v40_v53 }
  0x20   :  { %221 = vst [vmem:[#allocation5 + $0x38] sm:$0xff] %v184_v46  ;;  %v41_v58 = vld [vmem:[%s596_s0 + $0x60] sm:$0xff]  ;;  %222 = vst [vmem:[#allocation5 + $0x40] sm:$0xff] %v185_v51  ;;  %v42_v63 = vld [vmem:[%s596_s0 + $0x68] sm:$0xff] }
  0x21   :  { %v186_v56 = vadd.f32 %v149_v45, %v112_v47  ;;  %v78_v59 = vld [vmem:[%s597_s1 + $0x60] sm:$0xff]  ;;  %v187_v61 = vadd.f32 %v150_v50, %v113_v52  ;;  %v79_v0 = vld [vmem:[%s597_s1 + $0x68] sm:$0xff]  ;;  %v188_v2 = vadd.f32 %v151_v55, %v114_v57  ;;  %v43_v4 = vld [vmem:[%s596_s0 + $0x70] sm:$0xff] }
  0x22   :  { %v152_v60 = vld [vmem:[#allocation2 + $0x60] sm:$0xff]  ;;  %v115_v62 = vadd.f32 %v78_v59, %v41_v58  ;;  %v153_v1 = vld [vmem:[#allocation2 + $0x68] sm:$0xff]  ;;  %v116_v3 = vadd.f32 %v79_v0, %v42_v63  ;;  %v80_v5 = vld [vmem:[%s597_s1 + $0x70] sm:$0xff] }
  0x23   :  { %223 = vst [vmem:[#allocation5 + $0x48] sm:$0xff] %v186_v56  ;;  %v154_v6 = vld [vmem:[#allocation2 + $0x70] sm:$0xff]  ;;  %224 = vst [vmem:[#allocation5 + $0x50] sm:$0xff] %v187_v61  ;;  %v117_v8 = vadd.f32 %v80_v5, %v43_v4  ;;  %v44_v9 = vld [vmem:[%s596_s0 + $0x78] sm:$0xff] }
  0x24   :  { %v189_v7 = vadd.f32 %v152_v60, %v115_v62  ;;  %v81_v10 = vld [vmem:[%s597_s1 + $0x78] sm:$0xff]  ;;  %225 = vst [vmem:[#allocation5 + $0x58] sm:$0xff] %v188_v2  ;;  %v190_v12 = vadd.f32 %v153_v1, %v116_v3  ;;  %v45_v14 = vld [vmem:[%s596_s0 + $0x80] sm:$0xff]  ;;  %v46_v19 = vld [vmem:[%s596_s0 + $0x88] sm:$0xff] }
  0x25   :  { %v155_v11 = vld [vmem:[#allocation2 + $0x78] sm:$0xff]  ;;  %v118_v13 = vadd.f32 %v81_v10, %v44_v9  ;;  %v82_v15 = vld [vmem:[%s597_s1 + $0x80] sm:$0xff]  ;;  %v191_v17 = vadd.f32 %v154_v6, %v117_v8  ;;  %v83_v20 = vld [vmem:[%s597_s1 + $0x88] sm:$0xff] }
  0x26   :  { %v156_v16 = vld [vmem:[#allocation2 + $0x80] sm:$0xff]  ;;  %226 = vst [vmem:[#allocation5 + $0x60] sm:$0xff] %v189_v7  ;;  %v119_v18 = vadd.f32 %v82_v15, %v45_v14  ;;  %v157_v21 = vld [vmem:[#allocation2 + $0x88] sm:$0xff]  ;;  %227 = vst [vmem:[#allocation5 + $0x68] sm:$0xff] %v190_v12  ;;  %v120_v23 = vadd.f32 %v83_v20, %v46_v19 }
  0x27   :  { %v192_v22 = vadd.f32 %v155_v11, %v118_v13  ;;  %v47_v24 = vld [vmem:[%s596_s0 + $0x90] sm:$0xff]  ;;  %228 = vst [vmem:[#allocation5 + $0x70] sm:$0xff] %v191_v17  ;;  %v48_v29 = vld [vmem:[%s596_s0 + $0x98] sm:$0xff]  ;;  %v49_v34 = vld [vmem:[%s596_s0 + $0xa0] sm:$0xff] }
  0x28   :  { %v84_v25 = vld [vmem:[%s597_s1 + $0x90] sm:$0xff]  ;;  %v193_v27 = vadd.f32 %v156_v16, %v119_v18  ;;  %v85_v30 = vld [vmem:[%s597_s1 + $0x98] sm:$0xff]  ;;  %v194_v32 = vadd.f32 %v157_v21, %v120_v23  ;;  %v86_v35 = vld [vmem:[%s597_s1 + $0xa0] sm:$0xff] }
  0x29   :  { %v158_v26 = vld [vmem:[#allocation2 + $0x90] sm:$0xff]  ;;  %v121_v28 = vadd.f32 %v84_v25, %v47_v24  ;;  %v159_v31 = vld [vmem:[#allocation2 + $0x98] sm:$0xff]  ;;  %229 = vst [vmem:[#allocation5 + $0x78] sm:$0xff] %v192_v22  ;;  %v122_v33 = vadd.f32 %v85_v30, %v48_v29  ;;  %v160_v36 = vld [vmem:[#allocation2 + $0xa0] sm:$0xff]  ;;  %v123_v38 = vadd.f32 %v86_v35, %v49_v34 }
  0x2a   :  { %230 = vst [vmem:[#allocation5 + $0x80] sm:$0xff] %v193_v27  ;;  %v50_v39 = vld [vmem:[%s596_s0 + $0xa8] sm:$0xff]  ;;  %231 = vst [vmem:[#allocation5 + $0x88] sm:$0xff] %v194_v32  ;;  %v51_v44 = vld [vmem:[%s596_s0 + $0xb0] sm:$0xff] }
  0x2b   :  { %v195_v37 = vadd.f32 %v158_v26, %v121_v28  ;;  %v87_v40 = vld [vmem:[%s597_s1 + $0xa8] sm:$0xff]  ;;  %v196_v42 = vadd.f32 %v159_v31, %v122_v33  ;;  %v88_v45 = vld [vmem:[%s597_s1 + $0xb0] sm:$0xff]  ;;  %v197_v47 = vadd.f32 %v160_v36, %v123_v38  ;;  %v52_v49 = vld [vmem:[%s596_s0 + $0xb8] sm:$0xff] }
  0x2c   :  { %v161_v41 = vld [vmem:[#allocation2 + $0xa8] sm:$0xff]  ;;  %v124_v43 = vadd.f32 %v87_v40, %v50_v39  ;;  %v162_v46 = vld [vmem:[#allocation2 + $0xb0] sm:$0xff]  ;;  %v125_v48 = vadd.f32 %v88_v45, %v51_v44  ;;  %v89_v50 = vld [vmem:[%s597_s1 + $0xb8] sm:$0xff] }
  0x2d   :  { %232 = vst [vmem:[#allocation5 + $0x90] sm:$0xff] %v195_v37  ;;  %v163_v51 = vld [vmem:[#allocation2 + $0xb8] sm:$0xff]  ;;  %233 = vst [vmem:[#allocation5 + $0x98] sm:$0xff] %v196_v42  ;;  %v126_v53 = vadd.f32 %v89_v50, %v52_v49  ;;  %v53_v54 = vld [vmem:[%s596_s0 + $0xc0] sm:$0xff] }
  0x2e   :  { %v198_v52 = vadd.f32 %v161_v41, %v124_v43  ;;  %v90_v55 = vld [vmem:[%s597_s1 + $0xc0] sm:$0xff]  ;;  %234 = vst [vmem:[#allocation5 + $0xa0] sm:$0xff] %v197_v47  ;;  %v199_v57 = vadd.f32 %v162_v46, %v125_v48  ;;  %v54_v59 = vld [vmem:[%s596_s0 + $0xc8] sm:$0xff]  ;;  %v55_v0 = vld [vmem:[%s596_s0 + $0xd0] sm:$0xff] }
  0x2f   :  { %v164_v56 = vld [vmem:[#allocation2 + $0xc0] sm:$0xff]  ;;  %v127_v58 = vadd.f32 %v90_v55, %v53_v54  ;;  %v91_v60 = vld [vmem:[%s597_s1 + $0xc8] sm:$0xff]  ;;  %v200_v62 = vadd.f32 %v163_v51, %v126_v53  ;;  %v92_v1 = vld [vmem:[%s597_s1 + $0xd0] sm:$0xff] }
  0x30   :  { %v165_v61 = vld [vmem:[#allocation2 + $0xc8] sm:$0xff]  ;;  %235 = vst [vmem:[#allocation5 + $0xa8] sm:$0xff] %v198_v52  ;;  %v128_v63 = vadd.f32 %v91_v60, %v54_v59  ;;  %v166_v2 = vld [vmem:[#allocation2 + $0xd0] sm:$0xff]  ;;  %236 = vst [vmem:[#allocation5 + $0xb0] sm:$0xff] %v199_v57  ;;  %v129_v4 = vadd.f32 %v92_v1, %v55_v0 }
  0x31   :  { %v201_v3 = vadd.f32 %v164_v56, %v127_v58  ;;  %v56_v5 = vld [vmem:[%s596_s0 + $0xd8] sm:$0xff]  ;;  %237 = vst [vmem:[#allocation5 + $0xb8] sm:$0xff] %v200_v62  ;;  %v57_v10 = vld [vmem:[%s596_s0 + $0xe0] sm:$0xff]  ;;  %v58_v15 = vld [vmem:[%s596_s0 + $0xe8] sm:$0xff] }
  0x32   :  { %v93_v6 = vld [vmem:[%s597_s1 + $0xd8] sm:$0xff]  ;;  %v202_v8 = vadd.f32 %v165_v61, %v128_v63  ;;  %v94_v11 = vld [vmem:[%s597_s1 + $0xe0] sm:$0xff]  ;;  %v203_v13 = vadd.f32 %v166_v2, %v129_v4  ;;  %v95_v16 = vld [vmem:[%s597_s1 + $0xe8] sm:$0xff] }
  0x33   :  { %v167_v7 = vld [vmem:[#allocation2 + $0xd8] sm:$0xff]  ;;  %v130_v9 = vadd.f32 %v93_v6, %v56_v5  ;;  %v168_v12 = vld [vmem:[#allocation2 + $0xe0] sm:$0xff]  ;;  %238 = vst [vmem:[#allocation5 + $0xc0] sm:$0xff] %v201_v3  ;;  %v131_v14 = vadd.f32 %v94_v11, %v57_v10  ;;  %v169_v17 = vld [vmem:[#allocation2 + $0xe8] sm:$0xff]  ;;  %v132_v19 = vadd.f32 %v95_v16, %v58_v15 }
  0x34   :  { %239 = vst [vmem:[#allocation5 + $0xc8] sm:$0xff] %v202_v8  ;;  %v59_v20 = vld [vmem:[%s596_s0 + $0xf0] sm:$0xff]  ;;  %240 = vst [vmem:[#allocation5 + $0xd0] sm:$0xff] %v203_v13  ;;  %v60_v25 = vld [vmem:[%s596_s0 + $0xf8] sm:$0xff] }
  0x35   :  { %v204_v18 = vadd.f32 %v167_v7, %v130_v9  ;;  %v96_v21 = vld [vmem:[%s597_s1 + $0xf0] sm:$0xff]  ;;  %v205_v23 = vadd.f32 %v168_v12, %v131_v14  ;;  %v97_v26 = vld [vmem:[%s597_s1 + $0xf8] sm:$0xff]  ;;  %v206_v28 = vadd.f32 %v169_v17, %v132_v19  ;;  %v61_v30 = vld [vmem:[%s596_s0 + $0x100] sm:$0xff] }
  0x36   :  { %v170_v22 = vld [vmem:[#allocation2 + $0xf0] sm:$0xff]  ;;  %v133_v24 = vadd.f32 %v96_v21, %v59_v20  ;;  %v171_v27 = vld [vmem:[#allocation2 + $0xf8] sm:$0xff]  ;;  %v134_v29 = vadd.f32 %v97_v26, %v60_v25  ;;  %v98_v31 = vld [vmem:[%s597_s1 + $0x100] sm:$0xff] }
  0x37   :  { %241 = vst [vmem:[#allocation5 + $0xd8] sm:$0xff] %v204_v18  ;;  %v172_v32 = vld [vmem:[#allocation2 + $0x100] sm:$0xff]  ;;  %242 = vst [vmem:[#allocation5 + $0xe0] sm:$0xff] %v205_v23  ;;  %v135_v34 = vadd.f32 %v98_v31, %v61_v30  ;;  %v62_v35 = vld [vmem:[%s596_s0 + $0x108] sm:$0xff] }
  0x38   :  { %v207_v33 = vadd.f32 %v170_v22, %v133_v24  ;;  %v99_v36 = vld [vmem:[%s597_s1 + $0x108] sm:$0xff]  ;;  %243 = vst [vmem:[#allocation5 + $0xe8] sm:$0xff] %v206_v28  ;;  %v208_v38 = vadd.f32 %v171_v27, %v134_v29  ;;  %v63_v40 = vld [vmem:[%s596_s0 + $0x110] sm:$0xff]  ;;  %v64_v45 = vld [vmem:[%s596_s0 + $0x118] sm:$0xff] }
  0x39   :  { %v173_v37 = vld [vmem:[#allocation2 + $0x108] sm:$0xff]  ;;  %v136_v39 = vadd.f32 %v99_v36, %v62_v35  ;;  %v100_v41 = vld [vmem:[%s597_s1 + $0x110] sm:$0xff]  ;;  %v209_v43 = vadd.f32 %v172_v32, %v135_v34  ;;  %v101_v46 = vld [vmem:[%s597_s1 + $0x118] sm:$0xff] }
  0x3a   :  { %v174_v42 = vld [vmem:[#allocation2 + $0x110] sm:$0xff]  ;;  %244 = vst [vmem:[#allocation5 + $0xf0] sm:$0xff] %v207_v33  ;;  %v137_v44 = vadd.f32 %v100_v41, %v63_v40  ;;  %v175_v47 = vld [vmem:[#allocation2 + $0x118] sm:$0xff]  ;;  %245 = vst [vmem:[#allocation5 + $0xf8] sm:$0xff] %v208_v38  ;;  %v138_v49 = vadd.f32 %v101_v46, %v64_v45 }
  0x3b   :  { %v210_v48 = vadd.f32 %v173_v37, %v136_v39  ;;  %v65_v50 = vld [vmem:[%s596_s0 + $0x120] sm:$0x3f]  ;;  %246 = vst [vmem:[#allocation5 + $0x100] sm:$0xff] %v209_v43 }
  0x3c   :  { %v102_v51 = vld [vmem:[%s597_s1 + $0x120] sm:$0x3f]  ;;  %v211_v53 = vadd.f32 %v174_v42, %v137_v44  ;;  %v212_v55 = vadd.f32 %v175_v47, %v138_v49 }
  0x3d   :  { %v176_v52 = vld [vmem:[#allocation2 + $0x120] sm:$0x3f]  ;;  %v139_v54 = vadd.f32 %v102_v51, %v65_v50  ;;  %247 = vst [vmem:[#allocation5 + $0x108] sm:$0xff] %v210_v48 }
  0x3e   :  { %248 = vst [vmem:[#allocation5 + $0x110] sm:$0xff] %v211_v53  ;;  %249 = vst [vmem:[#allocation5 + $0x118] sm:$0xff] %v212_v55 }
  0x3f   :  { %v213_v56 = vadd.f32 %v176_v52, %v139_v54 }
  0x41   :  { %250 = vst [vmem:[#allocation5 + $0x120] sm:$0x3f] %v213_v56 }
  0x42   :  { %305 = shalt.err (!%p302_p12)
}
  0x43   :  { %s306_s19 = scalar_lea.hbm %s599_s3, 4736 }
  0x44   :  { %p307_p13 = scmp.ne.s32.totalorder %s599_s3, %s306_s19  ;;  %p310_p0 = scmp.lt.u32.totalorder %s306_s19, %s599_s3 }
  0x46   :  { %p312_p1 = pnand %p310_p0, %p307_p13 }
  0x48   :  { %315 = shalt.err (!%p312_p1)
}
  0x49   :  { %262 = dma.vmem_to_hbm [thread:$0]  %s257_s13, 4736, %s599_s3, [#allocation4], %s321_s22, %s321_s22, %s322_s23  }
  0x4a   :  { %318 = dma.done.wait [#allocation4], 4736  }
  0x4b   :  { %319 = vsyncadd [#allocation4], 4294962560 }
  0x4c   :  { %266 = vsyncpa [#allocation3], 1 }
  0x4d   :  { %267 = vsyncpa [#allocation4], 1 }

</bundles_post_ra>
